<compile_context>
chip_gen: v7x
topology: tpu7x:2x2x1
jax: 0.10.0
libtpu: 0.0.40
codegen_flags: <defaults>
</compile_context>

<pallas_src>
import functools

import jax
import jax.numpy as jnp
from jax.experimental import pallas as pl
from jax.experimental.pallas import tpu as pltpu


# ----------------------------------------------------------------------------
# Synthetic reward function (pure-JAX reference only; the SAME math is fused
# inside the Pallas kernel).  Mirrors a typical "reward_func.forward(A, M, b)"
# returning (sparse_ref, iter_ref, res_ref):
#   sparse_ref: (B,)   per-batch sparsity of the preconditioner M
#   iter_ref:   ()     scalar reference iteration score
#   res_ref:    (B, 1) per-batch residual norm of b - A @ (M @ b)
# TODO(synk): the module's reward_func is a pluggable external nn.Module; an
# arbitrary user-supplied reward cannot be generically fused, so this
# deterministic synthetic stand-in is what gets fused into the kernel (keep
# the pure-JAX reference path below selectable for any other reward_func).
# ----------------------------------------------------------------------------
def reward_func_forward(A, M, b):
    sparse_ref = jnp.mean((jnp.abs(M) < 1e-6).astype(jnp.float32), axis=(1, 2))
    x = jnp.einsum("bij,bj->bi", M, b)
    r = b - jnp.einsum("bij,bj->bi", A, x)
    res_ref = jnp.sqrt(jnp.sum(r * r, axis=-1, keepdims=True))  # (B, 1)
    iter_ref = jnp.mean(res_ref)                                 # scalar
    return sparse_ref, iter_ref, res_ref


# ----------------------------------------------------------------------------
# Fused Pallas kernel.  Computes, entirely in VMEM/VPU/XLU:
#   sparse_ref[b] = mean(|M[b]| < 1e-6)
#   res_ref[b]    = || b[b] - A[b] @ (M[b] @ b[b]) ||_2
#   iter_ref      = mean_b(res_ref[b])
#   sparse_error  = mean((sparse_est - sparse_ref)^2)
#   iter_error    = (max(iter_est) - iter_ref)^2
#   res_error     = mean((res_est - res_ref)^2)
#   loss          = a1*sparse_error + a2*iter_error + a3*res_error
#
# A and M arrive in natural (B, N, N) layout.  The matvecs are VPU broadcast
# multiplies + XLU reduces; the (B, N, 1) <-> (B, 1, N) relayouts needed
# between them are done with an identity-mask multiply + sublane reduce
# (no transpose op, no MXU push/pop latency at N=16).
# ----------------------------------------------------------------------------
def _critic_loss_kernel(a_ref, m_ref, brow_ref, est_ref, out_ref, *, a1, a2, a3):
    n = m_ref.shape[-1]

    # Upcast once on load (in-kernel cast rides under the reduce critical
    # path; no wrapper-side convert kernels, halves DMA bytes if inputs are
    # ever bf16 on v6e/v7x).
    a = a_ref[...].astype(jnp.float32)          # (B, N, N)
    m = m_ref[...].astype(jnp.float32)          # (B, N, N)
    brow = brow_ref[...].astype(jnp.float32)    # (B, 1, N)
    est = est_ref[...].astype(jnp.float32)      # (B, 1, N+2) merged estimates

    # Static lane slices of the single merged critic-estimate buffer.
    sparse_est = est[:, :, 0:1]                 # (B, 1, 1)
    res_est = est[:, :, 1:2]                    # (B, 1, 1)
    iter_est = est[:, :, 2:]                    # (B, 1, N)

    # Identity mask: column -> row relayout as a VPU mul + sublane reduce.
    eye = (jax.lax.broadcasted_iota(jnp.int32, (n, n), 0)
           == jax.lax.broadcasted_iota(jnp.int32, (n, n), 1)
           ).astype(jnp.float32)                # (N, N)

    # ---- fused reward math ------------------------------------------------
    # Sparsity fraction of M per batch.
    mask = (jnp.abs(m) < 1e-6).astype(jnp.float32)                  # (B, N, N)
    cnt = jnp.sum(jnp.sum(mask, axis=2, keepdims=True),
                  axis=1, keepdims=True)                            # (B, 1, 1)
    sparse_ref = cnt * (1.0 / float(n * n))                         # (B, 1, 1)

    # x = M @ b  per batch: lane reduce -> column, relayout -> row.
    x_col = jnp.sum(m * brow, axis=2, keepdims=True)                # (B, N, 1)
    x_row = jnp.sum(x_col * eye, axis=1, keepdims=True)             # (B, 1, N)
    # A @ x per batch: lane reduce -> column, relayout -> row.
    ax_col = jnp.sum(a * x_row, axis=2, keepdims=True)              # (B, N, 1)
    ax_row = jnp.sum(ax_col * eye, axis=1, keepdims=True)           # (B, 1, N)
    r_row = brow - ax_row                                           # (B, 1, N)
    res_ref = jnp.sqrt(jnp.sum(r_row * r_row, axis=2, keepdims=True))  # (B,1,1)
    iter_ref = jnp.mean(res_ref)                                    # scalar

    # ---- loss ---------------------------------------------------------------
    sd = sparse_est - sparse_ref
    sparse_error = jnp.mean(sd * sd)

    rd = res_est - res_ref
    res_error = jnp.mean(rd * rd)

    it_max = jnp.max(iter_est)
    iter_error = (it_max - iter_ref) ** 2

    # a1/a2/a3 are Python floats -> immediate operands.
    out_ref[0, 0] = a1 * sparse_error + a2 * iter_error + a3 * res_error


def critic_multi_reward_loss(sparse_est, iter_est, res_est, A, M, b,
                             a1, a2, a3):
    B, N, _ = M.shape
    a1, a2, a3 = float(a1), float(a2), float(a3)

    # Layout plumbing only (no dtype casts, no transposes, no reward math in
    # XLA glue):
    #  * A, M passed in their natural (B, N, N) layout.
    #  * b presented as a lane-dense (B, 1, N) row.
    #  * the three tiny critic estimates merged into ONE lane-dense buffer.
    b_row = b.reshape(B, 1, N)
    est = jnp.concatenate(
        [sparse_est.reshape(B, 1), res_est.reshape(B, 1),
         iter_est.reshape(B, -1)], axis=1).reshape(B, 1, -1)   # (B, 1, N+2)

    kernel = functools.partial(_critic_loss_kernel, a1=a1, a2=a2, a3=a3)

    # Advisory cost hint so XLA does not serialize neighbors around this tiny
    # opaque custom call when embedded in a larger jitted graph.
    flops = 10 * B * N * N
    bytes_accessed = 4 * (2 * B * N * N + B * N + int(est.size) + 1)
    cost = pl.CostEstimate(flops=flops, transcendentals=B,
                           bytes_accessed=bytes_accessed)

    out = pl.pallas_call(
        kernel,
        out_shape=jax.ShapeDtypeStruct((1, 1), jnp.float32),
        in_specs=[
            pl.BlockSpec(memory_space=pltpu.MemorySpace.VMEM),   # A
            pl.BlockSpec(memory_space=pltpu.MemorySpace.VMEM),   # M
            pl.BlockSpec(memory_space=pltpu.MemorySpace.VMEM),   # b (row)
            pl.BlockSpec(memory_space=pltpu.MemorySpace.VMEM),   # merged ests
        ],
        out_specs=pl.BlockSpec(memory_space=pltpu.MemorySpace.SMEM),
        cost_estimate=cost,
    )(A, M, b_row, est)
    return out[0, 0]


# Pure-JAX reference for correctness checking (mirrors the PyTorch forward).
def critic_multi_reward_loss_ref(sparse_est, iter_est, res_est, A, M, b,
                                 a1, a2, a3):
    sparse_ref, iter_ref, res_ref = reward_func_forward(A, M, b)
    sparse_ref = sparse_ref[..., None].astype(jnp.float32)
    sparse_error = jnp.mean((sparse_est - sparse_ref) ** 2)
    iter_error = (jnp.max(iter_est) - iter_ref) ** 2
    res_error = jnp.mean((res_est - res_ref) ** 2)
    return a1 * sparse_error + a2 * iter_error + a3 * res_error


if __name__ == "__main__":
    B, N = 2, 16
    key = jax.random.PRNGKey(0)
    k_a, k_m, k_mask, k_b, k_se, k_ie, k_re = jax.random.split(key, 7)

    A = jax.random.normal(k_a, (B, N, N), dtype=jnp.float32)
    M_dense = jax.random.normal(k_m, (B, N, N), dtype=jnp.float32)
    mask = jax.random.bernoulli(k_mask, p=0.4, shape=(B, N, N))
    M = jnp.where(mask, M_dense, 0.0)              # sparse-ish preconditioner
    b = jax.random.normal(k_b, (B, N), dtype=jnp.float32)

    sparse_est = jax.random.normal(k_se, (B, 1), dtype=jnp.float32)
    iter_est = jax.random.normal(k_ie, (B, N), dtype=jnp.float32)
    res_est = jax.random.normal(k_re, (B, 1), dtype=jnp.float32)

    a1, a2, a3 = 1.0, 0.5, 0.25

    loss = critic_multi_reward_loss(sparse_est, iter_est, res_est, A, M, b,
                                    a1, a2, a3)
    jax.block_until_ready(loss)

    loss_ref = critic_multi_reward_loss_ref(sparse_est, iter_est, res_est,
                                            A, M, b, a1, a2, a3)
    assert jnp.allclose(loss, loss_ref, rtol=1e-4, atol=1e-3), (loss, loss_ref)

    print("KERNEL_OK")
</pallas_src>

<mosaic_0001>
module attributes {stable_mosaic.version = 11 : i64} {
  func.func @_critic_loss_kernel(%arg0: memref<2x16x16xf32, #tpu.memory_space<vmem>>, %arg1: memref<2x16x16xf32, #tpu.memory_space<vmem>>, %arg2: memref<2x1x16xf32, #tpu.memory_space<vmem>>, %arg3: memref<2x1x18xf32, #tpu.memory_space<vmem>>, %arg4: memref<1x1xf32, #tpu.memory_space<smem>>) attributes {dimension_semantics = [], scalar_prefetch = 0 : i64, scratch_operands = 0 : i64, tpu.core_type = #tpu.core_type<tc>} {
    %c0 = arith.constant 0 : index
    %c0_0 = arith.constant 0 : index
    %c0_1 = arith.constant 0 : index
    %0 = vector.load %arg0[%c0, %c0_0, %c0_1] : memref<2x16x16xf32, #tpu.memory_space<vmem>>, vector<2x16x16xf32>
    %c0_2 = arith.constant 0 : index
    %c0_3 = arith.constant 0 : index
    %c0_4 = arith.constant 0 : index
    %1 = vector.load %arg1[%c0_2, %c0_3, %c0_4] : memref<2x16x16xf32, #tpu.memory_space<vmem>>, vector<2x16x16xf32>
    %c0_5 = arith.constant 0 : index
    %c0_6 = arith.constant 0 : index
    %c0_7 = arith.constant 0 : index
    %2 = vector.load %arg2[%c0_5, %c0_6, %c0_7] : memref<2x1x16xf32, #tpu.memory_space<vmem>>, vector<2x1x16xf32>
    %c0_8 = arith.constant 0 : index
    %c0_9 = arith.constant 0 : index
    %c0_10 = arith.constant 0 : index
    %3 = vector.load %arg3[%c0_8, %c0_9, %c0_10] : memref<2x1x18xf32, #tpu.memory_space<vmem>>, vector<2x1x18xf32>
    %4 = vector.extract_strided_slice %3 {offsets = [0, 0, 0], sizes = [2, 1, 1], strides = [1, 1, 1]} : vector<2x1x18xf32> to vector<2x1x1xf32>
    %5 = vector.extract_strided_slice %3 {offsets = [0, 0, 1], sizes = [2, 1, 1], strides = [1, 1, 1]} : vector<2x1x18xf32> to vector<2x1x1xf32>
    %6 = vector.extract_strided_slice %3 {offsets = [0, 0, 2], sizes = [2, 1, 16], strides = [1, 1, 1]} : vector<2x1x18xf32> to vector<2x1x16xf32>
    %7 = tpu.iota {dimensions = array<i32: 0>} : vector<16x16xi32>
    %8 = tpu.iota {dimensions = array<i32: 1>} : vector<16x16xi32>
    %9 = arith.cmpi eq, %7, %8 : vector<16x16xi32>
    %10 = arith.extui %9 : vector<16x16xi1> to vector<16x16xi32>
    %11 = arith.sitofp %10 : vector<16x16xi32> to vector<16x16xf32>
    %12 = math.absf %1 : vector<2x16x16xf32>
    %cst = arith.constant 9.99999997E-7 : f32
    %13 = vector.broadcast %cst : f32 to vector<2x16x16xf32>
    %14 = arith.cmpf olt, %12, %13 : vector<2x16x16xf32>
    %15 = arith.extui %14 : vector<2x16x16xi1> to vector<2x16x16xi32>
    %16 = arith.sitofp %15 : vector<2x16x16xi32> to vector<2x16x16xf32>
    %cst_11 = arith.constant dense<0.000000e+00> : vector<2x16xf32>
    %17 = vector.multi_reduction <add>, %16, %cst_11 [2] : vector<2x16x16xf32> to vector<2x16xf32>
    %18 = vector.shape_cast %17 : vector<2x16xf32> to vector<2x16x1xf32>
    %cst_12 = arith.constant dense<0.000000e+00> : vector<2x1xf32>
    %19 = vector.multi_reduction <add>, %18, %cst_12 [1] : vector<2x16x1xf32> to vector<2x1xf32>
    %20 = vector.shape_cast %19 : vector<2x1xf32> to vector<2x1x1xf32>
    %cst_13 = arith.constant 3.906250e-03 : f32
    %21 = vector.broadcast %cst_13 : f32 to vector<2x1x1xf32>
    %22 = arith.mulf %20, %21 : vector<2x1x1xf32>
    %23 = vector.broadcast %2 : vector<2x1x16xf32> to vector<2x16x16xf32>
    %24 = arith.mulf %1, %23 : vector<2x16x16xf32>
    %cst_14 = arith.constant dense<0.000000e+00> : vector<2x16xf32>
    %25 = vector.multi_reduction <add>, %24, %cst_14 [2] : vector<2x16x16xf32> to vector<2x16xf32>
    %26 = vector.shape_cast %25 : vector<2x16xf32> to vector<2x16x1xf32>
    %27 = vector.shape_cast %11 : vector<16x16xf32> to vector<1x16x16xf32>
    %28 = vector.broadcast %26 : vector<2x16x1xf32> to vector<2x16x16xf32>
    %29 = vector.broadcast %27 : vector<1x16x16xf32> to vector<2x16x16xf32>
    %30 = arith.mulf %28, %29 : vector<2x16x16xf32>
    %cst_15 = arith.constant dense<0.000000e+00> : vector<2x16xf32>
    %31 = vector.multi_reduction <add>, %30, %cst_15 [1] : vector<2x16x16xf32> to vector<2x16xf32>
    %32 = vector.shape_cast %31 : vector<2x16xf32> to vector<2x1x16xf32>
    %33 = vector.broadcast %32 : vector<2x1x16xf32> to vector<2x16x16xf32>
    %34 = arith.mulf %0, %33 : vector<2x16x16xf32>
    %cst_16 = arith.constant dense<0.000000e+00> : vector<2x16xf32>
    %35 = vector.multi_reduction <add>, %34, %cst_16 [2] : vector<2x16x16xf32> to vector<2x16xf32>
    %36 = vector.shape_cast %35 : vector<2x16xf32> to vector<2x16x1xf32>
    %37 = vector.shape_cast %11 : vector<16x16xf32> to vector<1x16x16xf32>
    %38 = vector.broadcast %36 : vector<2x16x1xf32> to vector<2x16x16xf32>
    %39 = vector.broadcast %37 : vector<1x16x16xf32> to vector<2x16x16xf32>
    %40 = arith.mulf %38, %39 : vector<2x16x16xf32>
    %cst_17 = arith.constant dense<0.000000e+00> : vector<2x16xf32>
    %41 = vector.multi_reduction <add>, %40, %cst_17 [1] : vector<2x16x16xf32> to vector<2x16xf32>
    %42 = vector.shape_cast %41 : vector<2x16xf32> to vector<2x1x16xf32>
    %43 = arith.subf %2, %42 : vector<2x1x16xf32>
    %44 = arith.mulf %43, %43 : vector<2x1x16xf32>
    %cst_18 = arith.constant dense<0.000000e+00> : vector<2x1xf32>
    %45 = vector.multi_reduction <add>, %44, %cst_18 [2] : vector<2x1x16xf32> to vector<2x1xf32>
    %46 = vector.shape_cast %45 : vector<2x1xf32> to vector<2x1x1xf32>
    %47 = math.sqrt %46 : vector<2x1x1xf32>
    %48 = vector.shape_cast %47 : vector<2x1x1xf32> to vector<1x2x1x1xf32>
    %cst_19 = arith.constant dense<0.000000e+00> : vector<1xf32>
    %49 = vector.multi_reduction <add>, %48, %cst_19 [1, 2, 3] : vector<1x2x1x1xf32> to vector<1xf32>
    %50 = vector.shape_cast %49 : vector<1xf32> to vector<1x1x1x1xf32>
    %51 = vector.extract %50[0, 0, 0, 0] : f32 from vector<1x1x1x1xf32>
    %cst_20 = arith.constant 2.000000e+00 : f32
    %52 = arith.divf %51, %cst_20 : f32
    %53 = arith.subf %4, %22 : vector<2x1x1xf32>
    %54 = arith.mulf %53, %53 : vector<2x1x1xf32>
    %55 = vector.shape_cast %54 : vector<2x1x1xf32> to vector<1x2x1x1xf32>
    %cst_21 = arith.constant dense<0.000000e+00> : vector<1xf32>
    %56 = vector.multi_reduction <add>, %55, %cst_21 [1, 2, 3] : vector<1x2x1x1xf32> to vector<1xf32>
    %57 = vector.shape_cast %56 : vector<1xf32> to vector<1x1x1x1xf32>
    %58 = vector.extract %57[0, 0, 0, 0] : f32 from vector<1x1x1x1xf32>
    %cst_22 = arith.constant 2.000000e+00 : f32
    %59 = arith.divf %58, %cst_22 : f32
    %60 = arith.subf %5, %47 : vector<2x1x1xf32>
    %61 = arith.mulf %60, %60 : vector<2x1x1xf32>
    %62 = vector.shape_cast %61 : vector<2x1x1xf32> to vector<1x2x1x1xf32>
    %cst_23 = arith.constant dense<0.000000e+00> : vector<1xf32>
    %63 = vector.multi_reduction <add>, %62, %cst_23 [1, 2, 3] : vector<1x2x1x1xf32> to vector<1xf32>
    %64 = vector.shape_cast %63 : vector<1xf32> to vector<1x1x1x1xf32>
    %65 = vector.extract %64[0, 0, 0, 0] : f32 from vector<1x1x1x1xf32>
    %cst_24 = arith.constant 2.000000e+00 : f32
    %66 = arith.divf %65, %cst_24 : f32
    %67 = vector.shape_cast %6 : vector<2x1x16xf32> to vector<1x2x1x16xf32>
    %cst_25 = arith.constant dense<0xFF800000> : vector<1xf32>
    %68 = vector.multi_reduction <maximumf>, %67, %cst_25 [1, 2, 3] : vector<1x2x1x16xf32> to vector<1xf32>
    %69 = vector.shape_cast %68 : vector<1xf32> to vector<1x1x1x1xf32>
    %70 = vector.extract %69[0, 0, 0, 0] : f32 from vector<1x1x1x1xf32>
    %71 = arith.subf %70, %52 : f32
    %72 = arith.mulf %71, %71 : f32
    %cst_26 = arith.constant 1.000000e+00 : f32
    %73 = arith.mulf %cst_26, %59 : f32
    %cst_27 = arith.constant 5.000000e-01 : f32
    %74 = arith.mulf %cst_27, %72 : f32
    %75 = arith.addf %73, %74 : f32
    %cst_28 = arith.constant 2.500000e-01 : f32
    %76 = arith.mulf %cst_28, %66 : f32
    %77 = arith.addf %75, %76 : f32
    %c0_29 = arith.constant 0 : index
    %c0_30 = arith.constant 0 : index
    %78 = memref.load %arg4[%c0_29, %c0_30] : memref<1x1xf32, #tpu.memory_space<smem>>
    memref.store %77, %arg4[%c0_29, %c0_30] : memref<1x1xf32, #tpu.memory_space<smem>>
    return
  }
}

</mosaic_0001>

<bundles_post_ra>
// kernel: tpu_custom_call.1
= control target key start
LH: loop header
LB: loop body
LE: loop exit
PB: predicated region body
PF: predicated region fallthrough
CT: control target
= control target key end

     0   :  { %9 = vsyncpa [#allocation3], 0  ;;  %s561_s0 = inlined_call_operand.hbm [shape: f32[2,16,16], index: 0, kind: input, shape index: {}]   ;;  %s562_s1 = inlined_call_operand.hbm [shape: f32[2,16,16], index: 1, kind: input, shape index: {}]   ;;  %s563_s2 = inlined_call_operand.vmem [shape: f32[2,1,16], index: 2, kind: input, shape index: {}]   ;;  %s564_s3 = inlined_call_operand.vmem [shape: f32[2,1,18], index: 3, kind: input, shape index: {}]   ;;  %s565_s4 = inlined_call_operand.hbm [shape: f32[1,1], index: 4, kind: output, shape index: {}]  }
   0x1   :  { %10 = vsyncpa [#allocation6], 0 }
   0x2   :  { %11 = vsyncpa [#allocation4], 0  ;;  %s418_s15 = smov [#allocation2]   ;;  %s358_s19 = scalar_lea.hbm %s561_s0, 512 }
   0x3   :  { %s17_s16 = sshll.u32 %s418_s15, 4  ;;  %p359_p0 = scmp.ne.s32.totalorder %s561_s0, %s358_s19  ;;  %s18_s16 = int_to_ptr.vmem [resolvable:$true] %s17_s16 }
   0x4   :  { %p362_p1 = scmp.lt.u32.totalorder %s358_s19, %s561_s0 }
   0x6   :  { %p364_p2 = pnand %p362_p1, %p359_p0 }
   0x8   :  { %367 = shalt.err (!%p364_p2)
}
   0x9   :  { %s368_s24 = scalar_lea.vmem %s18_s16, 512  ;;  %p373_p4 = scmp.lt.s32.totalorder %s18_s16, %s18_s16 }
   0xa   :  { %p369_p3 = scmp.ne.s32.totalorder %s18_s16, %s368_s24  ;;  %p374_p5 = scmp.lt.s32.totalorder %s368_s24, %s368_s24 }
   0xc   :  { %p375_p6 = por %p374_p5, %p373_p4 }
   0xe   :  { %p376_p7 = pnand %p375_p6, %p369_p3 }
  0x10   :  { %379 = shalt.err (!%p376_p7)
}
  0x11   :  { %s419_s25 = smov 128   ;;  %s420_s26 = smov 8  }
  0x12   :  { %23 = dma.hbm_to_vmem [thread:$0]  %s561_s0, 512, %s18_s16, [#allocation3], %s419_s25, %s419_s25, %s420_s26  }
  0x13   :  { %s421_s29 = smov [#allocation5]   ;;  %s380_s7 = scalar_lea.hbm %s562_s1, 512 }
  0x14   :  { %s29_s30 = sshll.u32 %s421_s29, 4  ;;  %p381_p8 = scmp.ne.s32.totalorder %s562_s1, %s380_s7  ;;  %s30_s30 = int_to_ptr.vmem [resolvable:$true] %s29_s30 }
  0x15   :  { %p384_p9 = scmp.lt.u32.totalorder %s380_s7, %s562_s1 }
  0x17   :  { %p386_p10 = pnand %p384_p9, %p381_p8 }
  0x19   :  { %389 = shalt.err (!%p386_p10)
}
  0x1a   :  { %s390_s12 = scalar_lea.vmem %s30_s30, 512  ;;  %p395_p12 = scmp.lt.s32.totalorder %s30_s30, %s30_s30 }
  0x1b   :  { %p391_p11 = scmp.ne.s32.totalorder %s30_s30, %s390_s12  ;;  %p396_p13 = scmp.lt.s32.totalorder %s390_s12, %s390_s12 }
  0x1d   :  { %p397_p0 = por %p396_p13, %p395_p12 }
  0x1f   :  { %p398_p1 = pnand %p397_p0, %p391_p11 }
  0x21   :  { %401 = shalt.err (!%p398_p1)
}
  0x22   :  { %35 = dma.hbm_to_vmem [thread:$0]  %s562_s1, 512, %s30_s30, [#allocation6], %s419_s25, %s419_s25, %s420_s26  }
  0x23   :  { %412 = dma.done.wait [#allocation3], 512  }
  0x24   :  { %413 = vsyncadd [#allocation3], 4294966784 }
  0x25   :  { %414 = dma.done.wait [#allocation6], 512  }
  0x26   :  { %415 = vsyncadd [#allocation6], 4294966784  ;;  %v58_v0 = vlaneseq  ;;  %v476_v4 = vld [vmem:[#allocation5 + $0x10] sm:$0xff]  ;;  %v481_v5 = vld [vmem:[%s563_s2 + $0x1] sm:$0x1]  ;;  %vm85_vm1 = vcmask 130048  }
  0x27   :  { %v483_v6 = vld [vmem:[#allocation5] sm:$0xff]  ;;  %v492_v9 = vld [vmem:[#allocation5 + $0x18] sm:$0xff]  ;;  %v494_v10 = vld [vmem:[#allocation5 + $0x8] sm:$0xff]  ;;  %v422_v21 = vmov 0.0   ;;  %vm206_vm4 = vcmask 122880   ;;  %s423_s20 = smov 127  }
  0x28   :  { %v59_v1 = vshrl.u32 %v58_v0, 7  ;;  %v62_v2 = vand.u32 127, %v58_v0  ;;  %v490_v8 = vld [vmem:[%s563_s2] sm:$0x1]  ;;  %v47_v48 = vld [vmem:[#allocation2 + $0x8] sm:$0xff]  ;;  %v49_v52 = vld [vmem:[#allocation2 + $0x18] sm:$0xff] }
  0x29   :  { %v46_v49 = vld [vmem:[#allocation2] sm:$0xff]  ;;  %v48_v53 = vld [vmem:[#allocation2 + $0x10] sm:$0xff]  ;;  %vm227_vm12 = vcmask 0   ;;  %vm297_vm13 = vcmask 139280   ;;  %s402_s9 = scalar_lea.hbm %s565_s4, 16 }
  0x2a   :  { %v474_v3 = vsub.s32 0, %v59_v1  ;;  %vm63_vm0 = vcmp.eq.s32.totalorder %v59_v1, %v62_v2  ;;  %v60_v20 = vadd.s32 8, %v59_v1  ;;  %p403_p2 = scmp.ne.s32.totalorder %s565_s4, %s402_s9  ;;  %p406_p3 = scmp.lt.u32.totalorder %s402_s9, %s565_s4 }
  0x2b   :  { %v333_v22 = vsel %vm63_vm0, 1.0, %v422_v21 }
  0x2c   :  { %v123_v7 = vrot.slane %v481_v5, %v474_v3  ;;  %v119_v11 = vrot.slane %v490_v8, %v474_v3  ;;  %vm64_vm2 = vcmp.eq.s32.totalorder %v60_v20, %v62_v2  ;;  %p408_p4 = pnand %p406_p3, %p403_p2 }
  0x2d   :  { %v334_v26 = vsel %vm64_vm2, 1.0, %v422_v21 }
  0x2e   :  { %v128_v12 = vmul.f32 %v123_v7, %v476_v4  ;;  %v129_v13 = vmul.f32 %v123_v7, %v492_v9  ;;  %v126_v14 = vmul.f32 %v119_v11, %v483_v6  ;;  %v127_v15 = vmul.f32 %v119_v11, %v494_v10 }
  0x30   :  { %v136_v16 = vsel %vm85_vm1, %v128_v12, 0.0  ;;  %v130_v17 = vsel %vm85_vm1, %v126_v14, 0.0  ;;  %v139_v18 = vsel %vm85_vm1, %v129_v13, 0.0  ;;  %v133_v19 = vsel %vm85_vm1, %v127_v15, 0.0 }
  0x31   :  { %137 = vadd.xlane.f32.xlu1 %v136_v16  ;;  %131 = vadd.xlane.f32.xlu0 %v130_v17 }
  0x35   :  { %140 = vadd.xlane.f32.xlu1 %v139_v18  ;;  %134 = vadd.xlane.f32.xlu0 %v133_v19 }
  0xbe   :  { %v138_v23 = vpop.xlane.xlu1 %137  ;;  %v132_v25 = vpop.xlane.xlu0 %131 }
  0xbf   :  { %v144_v24 = vmul.f32 %v333_v22, %v138_v23  ;;  %v142_v27 = vmul.f32 %v333_v22, %v132_v25 }
  0xc1   :  { %v155_v29 = vsel %vm85_vm1, %v144_v24, 0.0  ;;  %v146_v34 = vsel %vm85_vm1, %v142_v27, 0.0 }
  0xc2   :  { %v141_v28 = vpop.xlane.xlu1 %140  ;;  %v135_v31 = vpop.xlane.xlu0 %134 }
  0xc3   :  { %v145_v30 = vmul.f32 %v334_v26, %v141_v28  ;;  %v143_v32 = vmul.f32 %v334_v26, %v135_v31 }
  0xc5   :  { %v156_v33 = vsel %vm85_vm1, %v145_v30, 0.0  ;;  %v147_v36 = vsel %vm85_vm1, %v143_v32, 0.0  ;;  %v69_v30 = vand.u32 2147483647, %v483_v6  ;;  %v72_v6 = vand.u32 2147483647, %v492_v9 }
  0xc6   :  { %v157_v35 = vadd.f32 %v156_v33, %v155_v29  ;;  %v148_v37 = vadd.f32 %v147_v36, %v146_v34  ;;  %v71_v34 = vand.u32 2147483647, %v476_v4 }
  0xc7   :  { %vm73_vm3 = vcmp.lt.f32.partialorder %v69_v30, 1e-06  ;;  %vm76_vm7 = vcmp.lt.f32.partialorder %v72_v6, 1e-06 }
  0xc8   :  { %v158_v38 = vrot.slane %v157_v35, 4  ;;  %v149_v39 = vrot.slane %v148_v37, 4  ;;  %vm75_vm6 = vcmp.lt.f32.partialorder %v71_v34, 1e-06 }
  0xc9   :  { %v337_v4 = vsel %vm75_vm6, 1.0, %v422_v21 }
  0xca   :  { %v159_v40 = vadd.f32 %v158_v38, %v157_v35  ;;  %v150_v41 = vadd.f32 %v149_v39, %v148_v37  ;;  %v335_v37 = vsel %vm73_vm3, 1.0, %v422_v21 }
  0xcc   :  { %v160_v42 = vrot.slane %v159_v40, 2  ;;  %v151_v43 = vrot.slane %v150_v41, 2 }
  0xce   :  { %v161_v44 = vadd.f32 %v160_v42, %v159_v40  ;;  %v152_v45 = vadd.f32 %v151_v43, %v150_v41  ;;  %v92_v43 = vsel %vm85_vm1, %v337_v4, 0.0 }
  0xd0   :  { %v162_v46 = vrot.slane %v161_v44, 1  ;;  %v153_v47 = vrot.slane %v152_v45, 1 }
  0xd2   :  { %v154_v50 = vadd.f32 %v153_v47, %v152_v45  ;;  %v163_v51 = vadd.f32 %v162_v46, %v161_v44 }
  0xd4   :  { %v165_v54 = vmul.f32 %v154_v50, %v47_v48  ;;  %v164_v55 = vmul.f32 %v154_v50, %v46_v49  ;;  %v167_v58 = vmul.f32 %v163_v51, %v49_v52  ;;  %v166_v59 = vmul.f32 %v163_v51, %v48_v53 }
  0xd6   :  { %v171_v56 = vsel %vm85_vm1, %v165_v54, 0.0  ;;  %v168_v57 = vsel %vm85_vm1, %v164_v55, 0.0  ;;  %v177_v60 = vsel %vm85_vm1, %v167_v58, 0.0  ;;  %v174_v61 = vsel %vm85_vm1, %v166_v59, 0.0 }
  0xd7   :  { %172 = vadd.xlane.f32.xlu1 %v171_v56  ;;  %169 = vadd.xlane.f32.xlu0 %v168_v57 }
  0xdb   :  { %178 = vadd.xlane.f32.xlu1 %v177_v60  ;;  %175 = vadd.xlane.f32.xlu0 %v174_v61 }
 0x164   :  { %v173_v62 = vpop.xlane.xlu1 %172  ;;  %v170_v63 = vpop.xlane.xlu0 %169 }
 0x165   :  { %v181_v0 = vmul.f32 %v334_v26, %v173_v62  ;;  %v180_v1 = vmul.f32 %v333_v22, %v170_v63 }
 0x167   :  { %v185_v2 = vsel %vm85_vm1, %v181_v0, 0.0  ;;  %v184_v7 = vsel %vm85_vm1, %v180_v1, 0.0  ;;  %v57_v0 = vld [vmem:[%s564_s3 + $0x1] sm:$0x1] }
 0x168   :  { %v186_v11 = vadd.f32 %v185_v2, %v184_v7  ;;  %v179_v12 = vpop.xlane.xlu1 %178  ;;  %v176_v13 = vpop.xlane.xlu0 %175 }
 0x169   :  { %v183_v14 = vmul.f32 %v334_v26, %v179_v12  ;;  %v182_v15 = vmul.f32 %v333_v22, %v176_v13  ;;  %v70_v26 = vand.u32 2147483647, %v494_v10 }
 0x16a   :  { %v187_v16 = vrot.slane %v186_v11, 4 }
 0x16b   :  { %v194_v17 = vsel %vm85_vm1, %v183_v14, 0.0  ;;  %v193_v18 = vsel %vm85_vm1, %v182_v15, 0.0  ;;  %vm74_vm5 = vcmp.lt.f32.partialorder %v70_v26, 1e-06 }
 0x16c   :  { %v188_v19 = vadd.f32 %v187_v16, %v186_v11  ;;  %v195_v20 = vadd.f32 %v194_v17, %v193_v18  ;;  %v336_v40 = vsel %vm74_vm5, 1.0, %v422_v21 }
 0x16d   :  { %v89_v42 = vsel %vm85_vm1, %v336_v40, 0.0 }
 0x16e   :  { %v189_v23 = vrot.slane %v188_v19, 2  ;;  %v196_v24 = vrot.slane %v195_v20, 4 }
 0x170   :  { %v197_v25 = vadd.f32 %v196_v24, %v195_v20  ;;  %v190_v27 = vadd.f32 %v189_v23, %v188_v19 }
 0x172   :  { %v198_v28 = vrot.slane %v197_v25, 2  ;;  %v191_v29 = vrot.slane %v190_v27, 1 }
 0x174   :  { %v192_v31 = vadd.f32 %v191_v29, %v190_v27  ;;  %v199_v32 = vadd.f32 %v198_v28, %v197_v25 }
 0x176   :  { %v202_v22 = vsub.f32 %v490_v8, %v192_v31  ;;  %v200_v33 = vrot.slane %v199_v32, 1  ;;  %v86_v8 = vsel %vm85_vm1, %v335_v37, 0.0 }
 0x178   :  { %v204_v35 = vmul.f32 %v202_v22, %v202_v22  ;;  %v201_v36 = vadd.f32 %v200_v33, %v199_v32 }
 0x17a   :  { %v207_v38 = vsel %vm206_vm4, %v204_v35, 0.0  ;;  %v203_v39 = vsub.f32 %v481_v5, %v201_v36  ;;  %v338_v5 = vsel %vm76_vm7, 1.0, %v422_v21  ;;  %v56_v21 = vld [vmem:[%s564_s3] sm:$0x1]  ;;  %v299_v36 = vsel %vm297_vm13, %v57_v0, -inf }
 0x17b   :  { %208 = vadd.xlane.f32.xlu0 %v207_v38  ;;  %v95_v9 = vsel %vm85_vm1, %v338_v5, 0.0  ;;  %v298_v35 = vsel %vm297_vm13, %v56_v21, -inf }
 0x17c   :  { %v205_v10 = vmul.f32 %v203_v39, %v203_v39  ;;  %v300_v38 = vmax.f32 %v298_v35, %v299_v36 }
 0x17e   :  { %v210_v41 = vsel %vm206_vm4, %v205_v10, 0.0 }
 0x17f   :  { %211 = vadd.xlane.f32.xlu1 %v210_v41  ;;  %87 = vadd.xlane.f32.xlu0 %v86_v8 }
 0x183   :  { %90 = vadd.xlane.f32.xlu1 %v89_v42  ;;  %93 = vadd.xlane.f32.xlu0 %v92_v43 }
 0x187   :  { %96 = vadd.xlane.f32.xlu1 %v95_v9 }
 0x208   :  { %v209_v44 = vpop.xlane.xlu0 %208 }
 0x209   :  { %354 = vrsqrt.f32 %v209_v44  ;;  %vm215_vm8 = vcmp.eq.f32.partialorder %v209_v44, inf  ;;  %v218_v54 = vand.u32 2147483648, %v209_v44  ;;  %vm217_vm9 = vcmp.eq.f32.partialorder %v209_v44, 0.0 }
 0x20c   :  { %v212_v45 = vpop.xlane.xlu1 %211  ;;  %v88_v46 = vpop.xlane.xlu0 %87 }
 0x20d   :  { %356 = vrsqrt.f32 %v212_v45  ;;  %vm222_vm10 = vcmp.eq.f32.partialorder %v212_v45, inf  ;;  %v225_v63 = vand.u32 2147483648, %v212_v45  ;;  %vm224_vm11 = vcmp.eq.f32.partialorder %v212_v45, 0.0 }
 0x210   :  { %v91_v47 = vpop.xlane.xlu1 %90  ;;  %v94_v49 = vpop.xlane.xlu0 %93 }
 0x211   :  { %v98_v48 = vadd.f32 %v91_v47, %v88_v46 }
 0x213   :  { %v355_v50 = vpop.eup %354  ;;  %v99_v51 = vrot.slane %v98_v48, 4 }
 0x214   :  { %v214_v52 = vmul.f32 %v355_v50, %v209_v44  ;;  %v97_v53 = vpop.xlane.xlu1 %96 }
 0x215   :  { %v105_v55 = vadd.f32 %v97_v53, %v94_v49  ;;  %v100_v57 = vadd.f32 %v99_v51, %v98_v48 }
 0x216   :  { %v216_v56 = vsel %vm215_vm8, %v209_v44, %v214_v52 }
 0x217   :  { %v357_v58 = vpop.eup %356  ;;  %v219_v59 = vsel %vm217_vm9, %v218_v54, %v216_v56  ;;  %v106_v60 = vrot.slane %v105_v55, 4  ;;  %v101_v11 = vrot.slane %v100_v57, 2 }
 0x218   :  { %v221_v61 = vmul.f32 %v357_v58, %v212_v45  ;;  %v262_v62 = vsub.f32 %v56_v21, %v219_v59  ;;  %v228_v34 = vsel %vm227_vm12, %v219_v59, 0.0 }
 0x219   :  { %v107_v1 = vadd.f32 %v106_v60, %v105_v55  ;;  %v102_v17 = vadd.f32 %v101_v11, %v100_v57 }
 0x21a   :  { %v264_v2 = vmul.f32 %v262_v62, %v262_v62  ;;  %v223_v7 = vsel %vm222_vm10, %v212_v45, %v221_v61 }
 0x21b   :  { %v226_v12 = vsel %vm224_vm11, %v225_v63, %v223_v7  ;;  %v108_v13 = vrot.slane %v107_v1, 2  ;;  %v103_v20 = vrot.slane %v102_v17, 1 }
 0x21c   :  { %v271_v14 = vrot.slane %v264_v2, %v474_v3  ;;  %v263_v15 = vsub.f32 %v57_v0, %v226_v12 }
 0x21d   :  { %v109_v18 = vadd.f32 %v108_v13, %v107_v1  ;;  %v104_v24 = vadd.f32 %v103_v20, %v102_v17 }
 0x21e   :  { %276 = vrot.lane.b32.xlu0 %v271_v14, %s423_s20  ;;  %v265_v16 = vmul.f32 %v263_v15, %v263_v15 }
 0x21f   :  { %v110_v23 = vrot.slane %v109_v18, 1  ;;  %v112_v27 = vmul.f32 0.00390625, %v104_v24 }
 0x220   :  { %v275_v19 = vrot.slane %v265_v16, %v474_v3  ;;  %v229_v3 = vsel %vm227_vm12, %v226_v12, 0.0 }
 0x221   :  { %v111_v25 = vadd.f32 %v110_v23, %v109_v18  ;;  %v243_v29 = vsub.f32 %v56_v21, %v112_v27  ;;  %v230_v37 = vadd.f32 %v229_v3, %v228_v34 }
 0x222   :  { %278 = vrot.lane.b32.xlu1 %v275_v19, %s423_s20 }
 0x223   :  { %v113_v28 = vmul.f32 0.00390625, %v111_v25  ;;  %v245_v31 = vmul.f32 %v243_v29, %v243_v29 }
 0x225   :  { %v244_v30 = vsub.f32 %v57_v0, %v113_v28  ;;  %v247_v26 = vsel %vm227_vm12, %v245_v31, 0.0 }
 0x227   :  { %v246_v32 = vmul.f32 %v244_v30, %v244_v30 }
 0x229   :  { %v248_v22 = vsel %vm227_vm12, %v246_v32, 0.0 }
 0x22a   :  { %v249_v33 = vadd.f32 %v248_v22, %v247_v26 }
 0x23d   :  { %250 = vadd.xlane.f32.xlu0 %v249_v33 }
 0x246   :  { %231 = vadd.xlane.f32.xlu1 %v230_v37 }
 0x24a   :  { %301 = vmax.xlane.f32.xlu1 %v300_v38 }
 0x290   :  { %v277_v39 = vpop.permute.xlu0 %276 }
 0x291   :  { %v282_v10 = vsel %vm227_vm12, %v277_v39, 0.0 }
 0x294   :  { %v279_v6 = vpop.permute.xlu1 %278 }
 0x295   :  { %v283_v8 = vsel %vm227_vm12, %v279_v6, 0.0 }
 0x296   :  { %v284_v40 = vadd.f32 %v283_v8, %v282_v10 }
 0x298   :  { %285 = vadd.xlane.f32.xlu0 %v284_v40 }
 0x2ca   :  { %v251_v4 = vpop.xlane.xlu0 %250 }
 0x2cb   :  { %v252_v41 = vrot.slane %v251_v4, 4 }
 0x2cd   :  { %v253_v42 = vadd.f32 %v252_v41, %v251_v4 }
 0x2cf   :  { %v254_v43 = vrot.slane %v253_v42, 2 }
 0x2d1   :  { %v255_v44 = vadd.f32 %v254_v43, %v253_v42 }
 0x2d3   :  { %v232_v5 = vpop.xlane.xlu1 %231  ;;  %v256_v47 = vrot.slane %v255_v44, 1 }
 0x2d4   :  { %v233_v9 = vrot.slane %v232_v5, 4 }
 0x2d5   :  { %v257_v50 = vadd.f32 %v256_v47, %v255_v44 }
 0x2d6   :  { %v234_v45 = vadd.f32 %v233_v9, %v232_v5 }
 0x2d7   :  { %v302_v52 = vpop.xlane.xlu1 %301 }
 0x2d8   :  { %v235_v46 = vrot.slane %v234_v45, 2  ;;  %v303_v53 = vrot.slane %v302_v52, 4 }
 0x2da   :  { %v236_v48 = vadd.f32 %v235_v46, %v234_v45  ;;  %v304_v54 = vmax.f32 %v302_v52, %v303_v53 }
 0x2dc   :  { %v237_v49 = vrot.slane %v236_v48, 1  ;;  %v305_v21 = vrot.slane %v304_v54, 2 }
 0x2de   :  { %v238_v51 = vadd.f32 %v237_v49, %v236_v48  ;;  %v306_v58 = vmax.f32 %v304_v54, %v305_v21 }
 0x2e0   :  { %339 = vpush %v238_v51  ;;  %v307_v61 = vrot.slane %v306_v58, 1 }
 0x2e1   :  { %341 = vpush %v257_v50 }
 0x2e2   :  { %v308_v0 = vmax.f32 %v306_v58, %v307_v61 }
 0x311   :  { %s340_s3 = spop %339 }
 0x312   :  { %s342_s21 = spop %341  ;;  %s242_s22 = smul.f32 0.5, %s340_s3 }
 0x313   :  { %s261_s28 = smul.f32 0.5, %s342_s21 }
 0x325   :  { %v286_v55 = vpop.xlane.xlu0 %285 }
 0x326   :  { %v287_v56 = vrot.slane %v286_v55, 4 }
 0x328   :  { %v288_v57 = vadd.f32 %v287_v56, %v286_v55 }
 0x32a   :  { %v289_v59 = vrot.slane %v288_v57, 2 }
 0x32c   :  { %v290_v60 = vadd.f32 %v289_v59, %v288_v57 }
 0x32e   :  { %v291_v62 = vrot.slane %v290_v60, 1 }
 0x330   :  { %v292_v63 = vadd.f32 %v291_v62, %v290_v60 }
 0x332   :  { %343 = vpush %v292_v63 }
 0x333   :  { %345 = vpush %v308_v0 }
 0x363   :  { %s344_s23 = spop %343 }
 0x364   :  { %s346_s24 = spop %345  ;;  %s296_s26 = smul.f32 0.5, %s344_s23 }
 0x365   :  { %s310_s25 = ssub.f32 %s346_s24, %s242_s22 }
 0x366   :  { %s314_s30 = smul.f32 0.25, %s296_s26 }
 0x367   :  { %s311_s27 = smul.f32 %s310_s25, %s310_s25 }
 0x369   :  { %s312_s29 = smul.f32 0.5, %s311_s27 }
 0x36b   :  { %s313_s5 = sadd.f32 %s312_s29, %s261_s28 }
 0x36d   :  { %s315_s6 = sadd.f32 %s314_s30, %s313_s5 }
 0x36f   :  { %317 = sst [smem:[#allocation7]] %s315_s6 }
 0x370   :  { %411 = shalt.err (!%p408_p4)
}
 0x371   :  { %s424_s13 = smov [#allocation7]  }
 0x372   :  { %325 = dma.smem_to_hbm %s424_s13, 16, %s565_s4, [#allocation4]  }
 0x373   :  { %416 = dma.done.wait [#allocation4], 16  }
 0x374   :  { %417 = vsyncadd [#allocation4], 4294967280 }
 0x375   :  { %329 = sfence }
 0x376   :  { %330 = vsyncpa [#allocation3], 1 }
 0x377   :  { %331 = vsyncpa [#allocation6], 1 }
 0x378   :  { %332 = vsyncpa [#allocation4], 1 }

</bundles_post_ra>
